<compile_context>
chip_gen: v7x
topology: tpu7x:2x2x1
jax: 0.10.0
libtpu: 0.0.40
codegen_flags: <defaults>
</compile_context>

<pallas_src>
import functools

import jax
import jax.numpy as jnp
from jax.experimental import pallas as pl
from jax.experimental.pallas import tpu as pltpu


def _round_up(x, m):
    return ((x + m - 1) // m) * m


def ffn_kernel(x_ref, w1_ref, b1_ref, w2_ref, b2_ref, o_ref):
    # x_ref : (TM, E)  input-token tile (double-buffered by Pallas)
    # w1_ref: (E, H)   bf16, whole weight resident in VMEM
    # b1_ref: (1, H)   f32
    # w2_ref: (H, E)   bf16, whole weight resident in VMEM
    # b2_ref: (1, E)   f32
    # o_ref : (TM, E)
    x = x_ref[...].astype(jnp.bfloat16)                       # bf16 MXU inputs
    h = jnp.dot(x, w1_ref[...], preferred_element_type=jnp.float32)
    h = jnp.maximum(h + b1_ref[...], 0.0)                     # bias+ReLU in f32
    h = h.astype(jnp.bfloat16)                                # narrow before 2nd pass
    y = jnp.dot(h, w2_ref[...], preferred_element_type=jnp.float32)
    o_ref[...] = (y + b2_ref[...]).astype(o_ref.dtype)


@functools.partial(jax.jit, static_argnames=("tm",))
def feed_forward_pallas(x, w1, b1, w2, b2, *, tm=1024):
    """x: (B, S, E) -> (B, S, E), equivalent to W2(relu(W1(x)))."""
    B, S, E = x.shape
    E2, H = w1.shape
    assert E2 == E and w2.shape == (H, E)
    N = B * S

    itemsize = jnp.dtype(x.dtype).itemsize
    # Sublane multiple for the streamed arrays: 8 for f32, 16 for bf16, 32 for i8.
    sublane = 8 * max(4 // itemsize, 1)

    # Big row tile (amortizes per-step overhead, large DMAs), clamped for tiny
    # inputs, and capped so the grid has >= 2 steps when there is enough work
    # (keeps both v7x TensorCores busy under dimension_semantics=("parallel",)).
    tm_eff = min(tm, _round_up(N, sublane))
    if N >= 2 * sublane:
        tm_eff = min(tm_eff, _round_up(pl.cdiv(N, 2), sublane))
    tm_eff = _round_up(tm_eff, sublane)
    grid = (pl.cdiv(N, tm_eff),)   # ragged last block handled by masked writeback

    x2 = x.reshape(N, E)
    # Pre-cast weights to bf16 once in the wrapper (explicit for both operands
    # of each dot so Mosaic never falls back to the slow f32 MXU emulation).
    w1b = w1.astype(jnp.bfloat16)
    w2b = w2.astype(jnp.bfloat16)
    b1r = b1.astype(jnp.float32).reshape(1, H)
    b2r = b2.astype(jnp.float32).reshape(1, E)

    w_bytes = w1b.size * 2 + w2b.size * 2 + b1r.size * 4 + b2r.size * 4
    cost = pl.CostEstimate(
        flops=4 * N * E * H,                                   # two GEMMs, real rows only
        transcendentals=0,
        bytes_accessed=int(2 * N * E * itemsize + w_bytes),
    )

    # Explicit VMEM budget: resident weights + double-buffered x/out tiles +
    # compiler-placed hidden staging (f32 + bf16), with headroom. Floor at
    # 32 MiB (v5e's scoped default is only 16 MiB), cap at 56 MiB so we never
    # ask for more than v7x's 64 MiB physical VMEM.
    budget = (w_bytes
              + 2 * tm_eff * E * itemsize          # x tile, double-buffered
              + 2 * tm_eff * E * itemsize          # out tile, double-buffered
              + tm_eff * H * (4 + 2))              # hidden activation staging
    vmem_limit = int(min(max(int(budget * 1.5) + (4 << 20), 32 << 20), 56 << 20))

    # TODO(synk): for very large E/H where even bf16 weights overflow the v7x
    # 64 MiB VMEM, add an H-reduction grid axis with a pl.when-initialized
    # accumulator instead of keeping the weights fully resident.
    out = pl.pallas_call(
        ffn_kernel,
        out_shape=jax.ShapeDtypeStruct((N, E), x.dtype),
        grid_spec=pltpu.PrefetchScalarGridSpec(
            num_scalar_prefetch=0,
            grid=grid,
            in_specs=[
                pl.BlockSpec((tm_eff, E), lambda i: (i, 0)),        # x tile (pipelined)
                pl.BlockSpec(memory_space=pltpu.MemorySpace.VMEM),  # W1 whole, single copy
                pl.BlockSpec(memory_space=pltpu.MemorySpace.VMEM),  # b1
                pl.BlockSpec(memory_space=pltpu.MemorySpace.VMEM),  # W2 whole, single copy
                pl.BlockSpec(memory_space=pltpu.MemorySpace.VMEM),  # b2
            ],
            out_specs=pl.BlockSpec((tm_eff, E), lambda i: (i, 0)),
        ),
        compiler_params=pltpu.CompilerParams(
            dimension_semantics=("parallel",),
            vmem_limit_bytes=vmem_limit,
        ),
        cost_estimate=cost,
    )(x2, w1b, b1r, w2b, b2r)

    return out.reshape(B, S, E)


def init_params(key, embedding_dim=128, ff_hidden_dim=512, dtype=jnp.float32):
    """Deterministic init matching torch.nn.Linear's uniform(-1/sqrt(fan_in), +)."""
    k1, k2, k3, k4 = jax.random.split(key, 4)
    lim1 = 1.0 / jnp.sqrt(embedding_dim)
    lim2 = 1.0 / jnp.sqrt(ff_hidden_dim)
    # Stored pre-transposed: w1 is (E, H), w2 is (H, E) so the kernel does x @ w.
    w1 = jax.random.uniform(k1, (embedding_dim, ff_hidden_dim), dtype, -lim1, lim1)
    b1 = jax.random.uniform(k2, (ff_hidden_dim,), dtype, -lim1, lim1)
    w2 = jax.random.uniform(k3, (ff_hidden_dim, embedding_dim), dtype, -lim2, lim2)
    b2 = jax.random.uniform(k4, (embedding_dim,), dtype, -lim2, lim2)
    return w1, b1, w2, b2


if __name__ == "__main__":
    key = jax.random.PRNGKey(0)
    kx, kp = jax.random.split(key)

    batch, seq = 2, 8
    embedding_dim, ff_hidden_dim = 128, 512

    x = jax.random.normal(kx, (batch, seq, embedding_dim), jnp.float32)
    w1, b1, w2, b2 = init_params(kp, embedding_dim, ff_hidden_dim)

    out = jax.block_until_ready(feed_forward_pallas(x, w1, b1, w2, b2))

    # Reference in plain JAX f32 (same math as the PyTorch module). bf16 MXU
    # inputs with f32 accumulation -> loosened tolerances.
    ref = jnp.maximum(x @ w1 + b1, 0.0) @ w2 + b2
    assert out.shape == (batch, seq, embedding_dim)
    assert jnp.allclose(out, ref, atol=2e-2, rtol=2e-2)

    # Multi-tile path with an evenly-split grid.
    x_big = jax.random.normal(jax.random.fold_in(kx, 1),
                              (4, 100, embedding_dim), jnp.float32)
    out_big = jax.block_until_ready(
        feed_forward_pallas(x_big, w1, b1, w2, b2, tm=512))
    ref_big = jnp.maximum(x_big @ w1 + b1, 0.0) @ w2 + b2
    assert jnp.allclose(out_big, ref_big, atol=2e-2, rtol=2e-2)

    # Ragged last block (token count not divisible by the tile): exercises the
    # masked-writeback path that replaced the old pad/slice wrapper passes.
    x_rag = jax.random.normal(jax.random.fold_in(kx, 2),
                              (3, 37, embedding_dim), jnp.float32)
    out_rag = jax.block_until_ready(feed_forward_pallas(x_rag, w1, b1, w2, b2))
    ref_rag = jnp.maximum(x_rag @ w1 + b1, 0.0) @ w2 + b2
    assert jnp.allclose(out_rag, ref_rag, atol=2e-2, rtol=2e-2)

    print("KERNEL_OK")
</pallas_src>

<mosaic_0001>
module attributes {stable_mosaic.version = 11 : i64} {
  func.func @ffn_kernel(%arg0: i32, %arg1: memref<8x128xf32, #tpu.memory_space<vmem>>, %arg2: memref<128x512xbf16, #tpu.memory_space<vmem>>, %arg3: memref<1x512xf32, #tpu.memory_space<vmem>>, %arg4: memref<512x128xbf16, #tpu.memory_space<vmem>>, %arg5: memref<1x128xf32, #tpu.memory_space<vmem>>, %arg6: memref<8x128xf32, #tpu.memory_space<vmem>>) attributes {dimension_semantics = [#tpu.dimension_semantics<parallel>], iteration_bounds = array<i64: 2>, scalar_prefetch = 0 : i64, scratch_operands = 0 : i64, tpu.core_type = #tpu.core_type<tc>, window_params = [{transform_indices = @transform_0, window_bounds = array<i64: 8, 128>}, {pipeline_mode = #tpu.pipeline_mode<synchronous>, transform_indices = @transform_1, window_bounds = array<i64: 128, 512>}, {pipeline_mode = #tpu.pipeline_mode<synchronous>, transform_indices = @transform_2, window_bounds = array<i64: 1, 512>}, {pipeline_mode = #tpu.pipeline_mode<synchronous>, transform_indices = @transform_3, window_bounds = array<i64: 512, 128>}, {pipeline_mode = #tpu.pipeline_mode<synchronous>, transform_indices = @transform_4, window_bounds = array<i64: 1, 128>}, {transform_indices = @transform_5, window_bounds = array<i64: 8, 128>}]} {
    %c0 = arith.constant 0 : index
    %c0_0 = arith.constant 0 : index
    %0 = vector.load %arg1[%c0, %c0_0] : memref<8x128xf32, #tpu.memory_space<vmem>>, vector<8x128xf32>
    %1 = arith.truncf %0 : vector<8x128xf32> to vector<8x128xbf16>
    %c0_1 = arith.constant 0 : index
    %c0_2 = arith.constant 0 : index
    %2 = vector.load %arg2[%c0_1, %c0_2] : memref<128x512xbf16, #tpu.memory_space<vmem>>, vector<128x512xbf16>
    %cst = arith.constant dense<0.000000e+00> : vector<8x512xf32>
    %3 = tpu.matmul %1, %2, %cst {dimension_numbers = #tpu.dot_dimension_numbers<[1], [0], [0], [1], [0, 0, 1, 1], [], []>} : vector<8x128xbf16>, vector<128x512xbf16>, vector<8x512xf32> -> vector<8x512xf32>
    %c0_3 = arith.constant 0 : index
    %c0_4 = arith.constant 0 : index
    %4 = vector.load %arg3[%c0_3, %c0_4] : memref<1x512xf32, #tpu.memory_space<vmem>>, vector<1x512xf32>
    %5 = vector.broadcast %4 : vector<1x512xf32> to vector<8x512xf32>
    %6 = arith.addf %3, %5 : vector<8x512xf32>
    %cst_5 = arith.constant 0.000000e+00 : f32
    %7 = vector.broadcast %cst_5 : f32 to vector<8x512xf32>
    %8 = arith.maximumf %6, %7 : vector<8x512xf32>
    %9 = arith.truncf %8 : vector<8x512xf32> to vector<8x512xbf16>
    %c0_6 = arith.constant 0 : index
    %c0_7 = arith.constant 0 : index
    %10 = vector.load %arg4[%c0_6, %c0_7] : memref<512x128xbf16, #tpu.memory_space<vmem>>, vector<512x128xbf16>
    %cst_8 = arith.constant dense<0.000000e+00> : vector<8x128xf32>
    %11 = tpu.matmul %9, %10, %cst_8 {dimension_numbers = #tpu.dot_dimension_numbers<[1], [0], [0], [1], [0, 0, 1, 1], [], []>} : vector<8x512xbf16>, vector<512x128xbf16>, vector<8x128xf32> -> vector<8x128xf32>
    %c0_9 = arith.constant 0 : index
    %c0_10 = arith.constant 0 : index
    %12 = vector.load %arg5[%c0_9, %c0_10] : memref<1x128xf32, #tpu.memory_space<vmem>>, vector<1x128xf32>
    %13 = vector.broadcast %12 : vector<1x128xf32> to vector<8x128xf32>
    %14 = arith.addf %11, %13 : vector<8x128xf32>
    %c0_11 = arith.constant 0 : index
    %c0_12 = arith.constant 0 : index
    %15 = vector.load %arg6[%c0_11, %c0_12] : memref<8x128xf32, #tpu.memory_space<vmem>>, vector<8x128xf32>
    tpu.vector_store %arg6[%c0_11, %c0_12], %14 {strides = array<i32>} : memref<8x128xf32, #tpu.memory_space<vmem>>, vector<8x128xf32>,
    return
  }
  func.func @transform_0(%arg0: i32) -> (i32, i32) {
    %c0_i32 = arith.constant 0 : i32
    %c0_i32_0 = arith.constant 0 : i32
    return %arg0, %c0_i32 : i32, i32
  }
  func.func @transform_1(%arg0: i32) -> (i32, i32) {
    %c0_i32 = arith.constant 0 : i32
    %c0_i32_0 = arith.constant 0 : i32
    %c0_i32_1 = arith.constant 0 : i32
    return %c0_i32, %c0_i32_0 : i32, i32
  }
  func.func @transform_2(%arg0: i32) -> (i32, i32) {
    %c0_i32 = arith.constant 0 : i32
    %c0_i32_0 = arith.constant 0 : i32
    %c0_i32_1 = arith.constant 0 : i32
    return %c0_i32, %c0_i32_0 : i32, i32
  }
  func.func @transform_3(%arg0: i32) -> (i32, i32) {
    %c0_i32 = arith.constant 0 : i32
    %c0_i32_0 = arith.constant 0 : i32
    %c0_i32_1 = arith.constant 0 : i32
    return %c0_i32, %c0_i32_0 : i32, i32
  }
  func.func @transform_4(%arg0: i32) -> (i32, i32) {
    %c0_i32 = arith.constant 0 : i32
    %c0_i32_0 = arith.constant 0 : i32
    %c0_i32_1 = arith.constant 0 : i32
    return %c0_i32, %c0_i32_0 : i32, i32
  }
  func.func @transform_5(%arg0: i32) -> (i32, i32) {
    %c0_i32 = arith.constant 0 : i32
    %c0_i32_0 = arith.constant 0 : i32
    return %arg0, %c0_i32 : i32, i32
  }
}

</mosaic_0001>

<bundles_post_ra>
// kernel: feed_forward_pallas.1
= control target key start
LH: loop header
LB: loop body
LE: loop exit
PB: predicated region body
PF: predicated region fallthrough
CT: control target
= control target key end

     0   :  { %10 = vsyncpa [#allocation3], 0  ;;  %s1577_s0 = inlined_call_operand.vmem [shape: f32[16,128], index: 0, kind: input, shape index: {}]   ;;  %s1578_s1 = inlined_call_operand.vmem [shape: bf16[128,512], index: 1, kind: input, shape index: {}]   ;;  %s1579_s2 = inlined_call_operand.vmem [shape: f32[1,512], index: 2, kind: input, shape index: {}]   ;;  %s1580_s3 = inlined_call_operand.vmem [shape: bf16[512,128], index: 3, kind: input, shape index: {}]   ;;  %s1581_s4 = inlined_call_operand.vmem [shape: f32[1,128], index: 4, kind: input, shape index: {}]   ;;  %s1582_s5 = inlined_call_operand.hbm [shape: f32[16,128], index: 5, kind: output, shape index: {}]  }
   0x1   :  { %12 = vsyncpa [#allocation3 + $0x1], 0  ;;  %s1279_s18 = smov 0   ;;  %s1281_s19 = smov 0  }
   0x2   :  { %s1283_s20 = smov 0   ;;  %s1285_s21 = smov 0  }
   0x3 LB: > { %s1300_s22 = sadd.s32 4294967295, %s1245_s21   ;;  %s944_s23 = sadd.s32 4294967294, %s1245_s21   ;;  %s1245_s21 = sphi %s1285_s21, %s1588_s21   ;;  %s1241_s20 = sphi %s1283_s20, %s1587_s20   ;;  %s1237_s19 = sphi %s1281_s19, %s1586_s19   ;;  %s1233_s18 = sphi %s1279_s18, %s1585_s18  }
   0x4   : > { %s1304_s24 = sadd.s32 1, %s1245_s21   ;;  %s135_s25 = sadd.s32 1, %s1241_s20 }
   0x5   : > { %s132_s26 = ssub.s32 %s1245_s21, %s1304_s24  ;;  %p145_p0 = scmp.ne.s32.totalorder %s1241_s20, %s1237_s19 }
   0x6   : > { %p133_p1 = scmp.eq.s32.totalorder %s132_s26, 0  ;;  %p146_p2 = scmp.eq.s32.totalorder %s1300_s22, 1 }
   0x7   : > { %p151_p3 = scmp.ne.s32.totalorder %s1237_s19, %s1233_s18  ;;  %p152_p4 = scmp.eq.s32.totalorder %s944_s23, 1 }
   0x8   : > { %s1315_s27 = scalar_select %p133_p1, %s1241_s20, %s135_s25  }
   0x9   : > { %p1317_p5 = por %p146_p2, %p145_p0  ;;  %p1321_p6 = por %p152_p4, %p151_p3 }
   0xa   : > { %p947_p7 = scmp.ge.s32.totalorder %s1245_s21, 1  ;;  %p189_p8 = scmp.lt.s32.totalorder %s1245_s21, 3 }
   0xc   : > { %p190_p9 = pnand %p947_p7, %p189_p8 }
   0xd   : > { %v1103_v0 = vld [vmem:[%s1578_s1 + $0x4] ss:$16 sps:$4 sm:$0xff] (!%p190_p9)   ;;  %v1105_v1 = vld [vmem:[%s1578_s1 + $0xc] ss:$16 sps:$4 sm:$0xff] (!%p190_p9)   ;;  %v1247_v2 = vmov (!%p190_p9), 0   ;;  %p216_p10 = scmp.lt.s32.totalorder (!%p190_p9), %s1300_s22, 1 }
   0xe   : > { %193 = sbr.rel (%p190_p9) target bundleno = 500 (0x1f4), region = 40  ;;  %469 = vmatprep.mubr.bf16.mxu0 (!%p190_p9), %v1247_v2  ;;  %510 = vmatprep.mubr.bf16.mxu1 (!%p190_p9), %v1247_v2  ;;  %v1107_v3 = vld [vmem:[%s1578_s1] ss:$16 sps:$4 sm:$0xff] (!%p190_p9)   ;;  %v1108_v4 = vld [vmem:[%s1578_s1 + $0x8] ss:$16 sps:$4 sm:$0xff] (!%p190_p9)   ;;  %s1016_s16 = sshll.u32 (!%p190_p9), %s1300_s22, 7 }
   0xf   : > { %437 = vmatprep.subr.bf16.mxu0 (!%p190_p9), %v1103_v0  ;;  %478 = vmatprep.subr.bf16.mxu1 (!%p190_p9), %v1105_v1  ;;  %v1109_v5 = vld [vmem:[%s1578_s1 + $0x24] ss:$16 sps:$4 sm:$0xff] (!%p190_p9)   ;;  %v1111_v6 = vld [vmem:[%s1578_s1 + $0x2c] ss:$16 sps:$4 sm:$0xff] (!%p190_p9)   ;;  %v1113_v7 = vld [vmem:[%s1578_s1 + $0x20] ss:$16 sps:$4 sm:$0xff] (!%p190_p9)   ;;  %s1535_s30 = scalar_lea.hbm (!%p190_p9), %s1582_s5, %s1016_s16 }
  0x10   : > { %438 = vmatpush1.bf16.msra.mxu0 (!%p190_p9), %v1107_v3  ;;  %479 = vmatpush1.bf16.msra.mxu1 (!%p190_p9), %v1108_v4  ;;  %v1114_v8 = vld [vmem:[%s1578_s1 + $0x28] ss:$16 sps:$4 sm:$0xff] (!%p190_p9)   ;;  %v1115_v9 = vld [vmem:[%s1578_s1 + $0x44] ss:$16 sps:$4 sm:$0xff] (!%p190_p9)   ;;  %v1117_v10 = vld [vmem:[%s1578_s1 + $0x4c] ss:$16 sps:$4 sm:$0xff] (!%p190_p9)   ;;  %v257_v3 = vlaneseq (!%p190_p9) }
  0x11   : > { %439 = vmatprep.subr.bf16.mxu0 (!%p190_p9), %v1109_v5  ;;  %480 = vmatprep.subr.bf16.mxu1 (!%p190_p9), %v1111_v6  ;;  %v1119_v11 = vld [vmem:[%s1578_s1 + $0x40] ss:$16 sps:$4 sm:$0xff] (!%p190_p9)   ;;  %v1120_v12 = vld [vmem:[%s1578_s1 + $0x48] ss:$16 sps:$4 sm:$0xff] (!%p190_p9)   ;;  %v1121_v13 = vld [vmem:[%s1578_s1 + $0x64] ss:$16 sps:$4 sm:$0xff] (!%p190_p9)  }
  0x12   : > { %v1123_v14 = vld [vmem:[%s1578_s1 + $0x6c] ss:$16 sps:$4 sm:$0xff] (!%p190_p9)   ;;  %v1125_v15 = vld [vmem:[%s1578_s1 + $0x60] ss:$16 sps:$4 sm:$0xff] (!%p190_p9)   ;;  %v1126_v16 = vld [vmem:[%s1578_s1 + $0x68] ss:$16 sps:$4 sm:$0xff] (!%p190_p9)  }
  0x13   : > { %v1127_v17 = vld [vmem:[%s1578_s1 + $0x84] ss:$16 sps:$4 sm:$0xff] (!%p190_p9)   ;;  %v1129_v18 = vld [vmem:[%s1578_s1 + $0x8c] ss:$16 sps:$4 sm:$0xff] (!%p190_p9)   ;;  %v1131_v19 = vld [vmem:[%s1578_s1 + $0x80] ss:$16 sps:$4 sm:$0xff] (!%p190_p9)  }
  0x14   : > { %440 = vmatpush1.bf16.msra.mxu0 (!%p190_p9), %v1113_v7  ;;  %481 = vmatpush1.bf16.msra.mxu1 (!%p190_p9), %v1114_v8  ;;  %v1132_v20 = vld [vmem:[%s1578_s1 + $0x88] ss:$16 sps:$4 sm:$0xff] (!%p190_p9)   ;;  %v1133_v21 = vld [vmem:[%s1578_s1 + $0xa4] ss:$16 sps:$4 sm:$0xff] (!%p190_p9)   ;;  %v1135_v22 = vld [vmem:[%s1578_s1 + $0xac] ss:$16 sps:$4 sm:$0xff] (!%p190_p9)  }
  0x15   : > { %441 = vmatprep.subr.bf16.mxu0 %v1115_v9  ;;  %482 = vmatprep.subr.bf16.mxu1 %v1117_v10  ;;  %s217_s15 = scalar_select %p216_p10, %s1300_s22, 1  ;;  %v1137_v23 = vld [vmem:[%s1578_s1 + $0xa0] ss:$16 sps:$4 sm:$0xff]   ;;  %v1138_v24 = vld [vmem:[%s1578_s1 + $0xa8] ss:$16 sps:$4 sm:$0xff]   ;;  %v258_v4 = vshrl.u32 %v257_v3, 7 }
  0x16   : > { %v1139_v25 = vld [vmem:[%s1578_s1 + $0xc4] ss:$16 sps:$4 sm:$0xff]   ;;  %v1141_v26 = vld [vmem:[%s1578_s1 + $0xcc] ss:$16 sps:$4 sm:$0xff]   ;;  %v1143_v27 = vld [vmem:[%s1578_s1 + $0xc0] ss:$16 sps:$4 sm:$0xff]  }
  0x17   : > { %s949_s6 = sshll.u32 %s217_s15, 3  ;;  %v1144_v28 = vld [vmem:[%s1578_s1 + $0xc8] ss:$16 sps:$4 sm:$0xff]   ;;  %v1145_v29 = vld [vmem:[%s1578_s1 + $0xe4] ss:$16 sps:$4 sm:$0xff]   ;;  %v259_v5 = vsub.s32 0, %v258_v4 }
  0x18   : > { %442 = vmatpush1.bf16.msra.mxu0 %v1119_v11  ;;  %483 = vmatpush1.bf16.msra.mxu1 %v1120_v12  ;;  %s219_s25 = scalar_lea.vmem %s1577_s0, %s949_s6  ;;  %v1147_v30 = vld [vmem:[%s1578_s1 + $0xec] ss:$16 sps:$4 sm:$0xff]   ;;  %v1149_v31 = vld [vmem:[%s1578_s1 + $0xe0] ss:$16 sps:$4 sm:$0xff]   ;;  %v1150_v32 = vld [vmem:[%s1578_s1 + $0xe8] ss:$16 sps:$4 sm:$0xff]  }
  0x19   : > { %443 = vmatprep.subr.bf16.mxu0 %v1121_v13  ;;  %484 = vmatprep.subr.bf16.mxu1 %v1123_v14  ;;  %v221_v33 = vld [vmem:[%s219_s25] sm:$0xff]  ;;  %v1155_v39 = vld [vmem:[%s1580_s3 + $0x48] sm:$0xff]   ;;  %v1159_v43 = vld [vmem:[%s1580_s3 + $0x50] sm:$0xff]   ;;  %v267_v6 = vsub.s32 2, %v258_v4  ;;  %v263_v8 = vsub.s32 1, %v258_v4  ;;  %v271_v9 = vsub.s32 3, %v258_v4 }
  0x1a   : > { %v1151_v34 = vld [vmem:[%s1580_s3 + $0x40] sm:$0xff]   ;;  %v222_v37 = vpack.c.bf16 %v221_v33, %v221_v33  ;;  %v1156_v40 = vld [vmem:[%s1580_s3 + $0xc8] sm:$0xff]   ;;  %v1160_v44 = vld [vmem:[%s1580_s3 + $0xd0] sm:$0xff]   ;;  %s213_s6 = sand.u32 1, %s1237_s19   ;;  %s1248_s22 = smov [#allocation2]  }
  0x1b   : > { %v1152_v35 = vld [vmem:[%s1580_s3 + $0xc0] sm:$0xff]   ;;  %v1157_v41 = vld [vmem:[%s1580_s3 + $0x8] sm:$0xff]   ;;  %v1161_v45 = vld [vmem:[%s1580_s3 + $0x10] sm:$0xff]   ;;  %s948_s13 = sshll.u32 %s213_s6, 3  ;;  %s872_s7 = scalar_lea.sflag [#allocation3], %s213_s6 }
  0x1c   : > { %444 = vmatpush1.bf16.msra.mxu0 %v1125_v15  ;;  %485 = vmatpush1.bf16.msra.mxu1 %v1126_v16  ;;  %v1153_v36 = vld [vmem:[%s1580_s3] sm:$0xff]   ;;  %v1158_v42 = vld [vmem:[%s1580_s3 + $0x88] sm:$0xff]   ;;  %v1162_v46 = vld [vmem:[%s1580_s3 + $0x90] sm:$0xff]   ;;  %s215_s17 = scalar_lea.vmem [#allocation2], %s948_s13  ;;  %s1187_s9 = sshll.u32 %s1248_s22, 4  ;;  %s1188_s9 = int_to_ptr.vmem [resolvable:$false] %s1187_s9 }
  0x1d   : > { %445 = vmatprep.subr.bf16.mxu0 %v1127_v17  ;;  %486 = vmatprep.subr.bf16.mxu1 %v1129_v18  ;;  %v1154_v38 = vld [vmem:[%s1580_s3 + $0x80] sm:$0xff]   ;;  %v1163_v47 = vld [vmem:[%s1580_s3 + $0x58] sm:$0xff]   ;;  %v1171_v55 = vld [vmem:[%s1580_s3 + $0x68] sm:$0xff]   ;;  %s885_s23 = sshll.u32 %s215_s17, 4  ;;  %s1189_s10 = scalar_lea.vmem %s1188_s9, 256  ;;  %s1537_s23 = int_to_ptr.vmem [resolvable:$true] %s885_s23 }
  0x1e   : > { %v1164_v48 = vld [vmem:[%s1580_s3 + $0xd8] sm:$0xff]   ;;  %v1167_v51 = vld [vmem:[%s1580_s3 + $0x60] sm:$0xff]   ;;  %v1172_v56 = vld [vmem:[%s1580_s3 + $0xe8] sm:$0xff]   ;;  %s1183_s8 = scalar_lea.vmem %s1537_s23, 128  ;;  %p1190_p0 = scmp.lt.s32.totalorder %s1537_s23, %s1188_s9 }
  0x1f   : > { %v1165_v49 = vld [vmem:[%s1580_s3 + $0x18] sm:$0xff]   ;;  %v1168_v52 = vld [vmem:[%s1580_s3 + $0xe0] sm:$0xff]   ;;  %v1173_v57 = vld [vmem:[%s1580_s3 + $0x28] sm:$0xff]   ;;  %p1184_p11 = scmp.ne.s32.totalorder %s1537_s23, %s1183_s8  ;;  %p1191_p1 = scmp.lt.s32.totalorder %s1189_s10, %s1183_s8 }
  0x20   : > { %446 = vmatpush1.bf16.msra.mxu0 %v1131_v19  ;;  %487 = vmatpush1.bf16.msra.mxu1 %v1132_v20  ;;  %v1166_v50 = vld [vmem:[%s1580_s3 + $0x98] sm:$0xff]   ;;  %v1169_v53 = vld [vmem:[%s1580_s3 + $0x20] sm:$0xff]   ;;  %v1174_v58 = vld [vmem:[%s1580_s3 + $0xa8] sm:$0xff]  }
  0x21   : > { %447 = vmatprep.subr.bf16.mxu0 %v1133_v21  ;;  %488 = vmatprep.subr.bf16.mxu1 %v1135_v22  ;;  %v1170_v54 = vld [vmem:[%s1580_s3 + $0xa0] sm:$0xff]   ;;  %v1175_v59 = vld [vmem:[%s1580_s3 + $0x70] sm:$0xff]   ;;  %v1179_v63 = vld [vmem:[%s1580_s3 + $0x78] sm:$0xff]   ;;  %p1185_p12 = pnand %p1184_p11, %p1317_p5  ;;  %p1192_p2 = por %p1191_p1, %p1190_p0 }
  0x22   : > { %v1176_v60 = vld [vmem:[%s1580_s3 + $0xf0] sm:$0xff]   ;;  %v1180_v0 = vld [vmem:[%s1580_s3 + $0xf8] sm:$0xff]   ;;  %v255_v7 = vld [vmem:[%s1579_s2] sm:$0xf] }
  0x23   : > { %v1177_v61 = vld [vmem:[%s1580_s3 + $0x30] sm:$0xff]   ;;  %v1181_v1 = vld [vmem:[%s1580_s3 + $0x38] sm:$0xff]   ;;  %v260_v10 = vrot.slane %v255_v7, %v259_v5  ;;  %v268_v11 = vrot.slane %v255_v7, %v267_v6  ;;  %v264_v12 = vrot.slane %v255_v7, %v263_v8  ;;  %v272_v13 = vrot.slane %v255_v7, %v271_v9  ;;  %p1186_p13 = pneg %p1185_p12 }
  0x24   : > { %448 = vmatpush1.bf16.msra.mxu0 %v1137_v23  ;;  %489 = vmatpush1.bf16.msra.mxu1 %v1138_v24  ;;  %v1178_v62 = vld [vmem:[%s1580_s3 + $0xb0] sm:$0xff]   ;;  %v1182_v2 = vld [vmem:[%s1580_s3 + $0xb8] sm:$0xff]  }
  0x25   : > { %449 = vmatprep.subr.bf16.mxu0 %v1139_v25  ;;  %490 = vmatprep.subr.bf16.mxu1 %v1141_v26  ;;  %p1193_p3 = pnand %p1192_p2, %p1186_p13 }
  0x28   : > { %450 = vmatpush1.bf16.msra.mxu0 %v1143_v27  ;;  %491 = vmatpush1.bf16.msra.mxu1 %v1144_v28 }
  0x29   : > { %451 = vmatprep.subr.bf16.mxu0 %v1145_v29  ;;  %492 = vmatprep.subr.bf16.mxu1 %v1147_v30 }
  0x2c   : > { %452 = vmatpush1.bf16.msra.mxu0 %v1149_v31  ;;  %493 = vmatpush1.bf16.msra.mxu1 %v1150_v32 }
  0x2d   : > { %1019 = vmatprep.subr.bf16.mxu0 %v1151_v34  ;;  %1041 = vmatprep.subr.bf16.mxu1 %v1152_v35 }
  0x2f   : > { %470 = vmatmul.mubr.bf16.vlgmr.msra.gmra.mrb[0].mxu0 %v222_v37  ;;  %511 = vmatmul.mubr.bf16.vlgmr.msra.gmra.mrb[0].mxu1 %v222_v37 }
  0x30   : > { %1020 = vmatpush3.bf16.msra.mxu0 %v1153_v36  ;;  %1042 = vmatpush3.bf16.msra.mxu1 %v1154_v38  ;;  %v982_v36 = vld [vmem:[%s1581_s4] ss:$0 sm:$0xff] }
  0x31   : > { %1021 = vmatprep.subr.bf16.mxu0 %v1155_v39  ;;  %1043 = vmatprep.subr.bf16.mxu1 %v1156_v40 }
  0x34   : > { %1022 = vmatpush3.bf16.msra.mxu0 %v1157_v41  ;;  %1044 = vmatpush3.bf16.msra.mxu1 %v1158_v42 }
  0x35   : > { %1023 = vmatprep.subr.bf16.mxu0 %v1159_v43  ;;  %1045 = vmatprep.subr.bf16.mxu1 %v1160_v44 }
  0x38   : > { %1024 = vmatpush3.bf16.msra.mxu0 %v1161_v45  ;;  %1046 = vmatpush3.bf16.msra.mxu1 %v1162_v46 }
  0x39   : > { %1025 = vmatprep.subr.bf16.mxu0 %v1163_v47  ;;  %1047 = vmatprep.subr.bf16.mxu1 %v1164_v48 }
  0x3c   : > { %1026 = vmatpush3.bf16.msra.mxu0 %v1165_v49  ;;  %1048 = vmatpush3.bf16.msra.mxu1 %v1166_v50 }
  0x3d   : > { %1027 = vmatprep.subr.bf16.mxu0 %v1167_v51  ;;  %1049 = vmatprep.subr.bf16.mxu1 %v1168_v52 }
  0x40   : > { %1028 = vmatpush3.bf16.msra.mxu0 %v1169_v53  ;;  %1050 = vmatpush3.bf16.msra.mxu1 %v1170_v54 }
  0x41   : > { %1029 = vmatprep.subr.bf16.mxu0 %v1171_v55  ;;  %1051 = vmatprep.subr.bf16.mxu1 %v1172_v56 }
  0x44   : > { %1030 = vmatpush3.bf16.msra.mxu0 %v1173_v57  ;;  %1052 = vmatpush3.bf16.msra.mxu1 %v1174_v58 }
  0x45   : > { %1031 = vmatprep.subr.bf16.mxu0 %v1175_v59  ;;  %1053 = vmatprep.subr.bf16.mxu1 %v1176_v60 }
  0x48   : > { %1032 = vmatpush3.bf16.msra.mxu0 %v1177_v61  ;;  %1054 = vmatpush3.bf16.msra.mxu1 %v1178_v62 }
  0x49   : > { %1033 = vmatprep.subr.bf16.mxu0 %v1179_v63  ;;  %1055 = vmatprep.subr.bf16.mxu1 %v1180_v0 }
  0x4c   : > { %1034 = vmatpush3.bf16.msra.mxu0 %v1181_v1  ;;  %1056 = vmatpush3.bf16.msra.mxu1 %v1182_v2 }
 0x102   : > { %v471_v14 = vpop.f32.mrb[0].mxu0  ;;  %v512_v15 = vpop.f32.mrb[0].mxu1 }
 0x103   : > { %v472_v16 = vadd.f32 %v471_v14, %v260_v10  ;;  %v513_v17 = vadd.f32 %v512_v15, %v268_v11  ;;  %v473_v18 = vpop.f32.mrb[1].mxu0  ;;  %v514_v19 = vpop.f32.mrb[1].mxu1 }
 0x104   : > { %v474_v20 = vadd.f32 %v473_v18, %v264_v12  ;;  %v515_v21 = vadd.f32 %v514_v19, %v272_v13  ;;  %v475_v22 = vpop.f32.mrb[2].mxu0  ;;  %v516_v23 = vpop.f32.mrb[2].mxu1 }
 0x105   : > { %v519_v24 = vmax.f32 %v472_v16, 0.0  ;;  %v521_v25 = vmax.f32 %v513_v17, 0.0  ;;  %v476_v26 = vpop.f32.mrb[3].mxu0  ;;  %v517_v27 = vpop.f32.mrb[3].mxu1 }
 0x106   : > { %v520_v28 = vmax.f32 %v474_v20, 0.0  ;;  %v522_v29 = vmax.f32 %v515_v21, 0.0 }
 0x107   : > { %v525_v30 = vpack.c.bf16 %v521_v25, %v521_v25  ;;  %v523_v33 = vpack.c.bf16 %v519_v24, %v519_v24 }
 0x108   : > { %v524_v31 = vpack.c.bf16 %v520_v28, %v520_v28  ;;  %v526_v32 = vpack.c.bf16 %v522_v29, %v522_v29 }
 0x10a   : > { %822 = vmatprep.mubr.bf16.mxu0 %v524_v31  ;;  %862 = vmatprep.mubr.bf16.mxu1 %v526_v32 }
 0x10b   : > { %823 = vmatmul.mubr.bf16.vlgmr.msra.gmra.mrb[4].mxu0 %v523_v33  ;;  %863 = vmatmul.mubr.bf16.vlgmr.msra.gmra.mrb[4].mxu1 %v525_v30 }
 0x1de   : > { %v1035_v34 = vpop.f32.mrb[4].mxu0  ;;  %v1057_v35 = vpop.f32.mrb[4].mxu1 }
 0x1df   : > { %v1036_v37 = vpop.f32.mrb[5].mxu0  ;;  %v1058_v38 = vpop.f32.mrb[5].mxu1 }
 0x1e0   : > { %v1037_v39 = vadd.f32 %v1036_v37, %v1035_v34  ;;  %v1059_v40 = vadd.f32 %v1058_v38, %v1057_v35  ;;  %v1038_v41 = vpop.f32.mrb[6].mxu0  ;;  %v1060_v42 = vpop.f32.mrb[6].mxu1 }
 0x1e1   : > { %v1039_v43 = vpop.f32.mrb[7].mxu0  ;;  %v1061_v44 = vpop.f32.mrb[7].mxu1 }
 0x1e2   : > { %v825_v45 = vadd.f32 %v1037_v39, %v982_v36 }
 0x1e4   : > { %v865_v46 = vadd.f32 %v1059_v40, %v825_v45 }
 0x1e6   : > { %870 = vst [vmem:[%s215_s17] sm:$0xff] %v865_v46 }
 0x1e7   : > { %1196 = shalt.err (!%p1193_p3)
}
 0x1e8   : > { %s1197_s11 = scalar_lea.hbm %s1535_s30, 128  ;;  %s1201_s13 = scalar_lea.hbm %s1582_s5, 256 }
 0x1e9   : > { %p1198_p4 = scmp.ne.s32.totalorder %s1535_s30, %s1197_s11  ;;  %p1202_p9 = scmp.lt.u32.totalorder %s1535_s30, %s1582_s5 }
 0x1ea   : > { %p1203_p10 = scmp.lt.u32.totalorder %s1201_s13, %s1197_s11  ;;  %p1205_p12 = scmp.lt.u32.totalorder %s1197_s11, %s1535_s30 }
 0x1eb   : > { %p1199_p7 = pnand %p1198_p4, %p1317_p5 }
 0x1ec   : > { %p1204_p11 = por %p1203_p10, %p1202_p9 }
 0x1ed   : > { %p1200_p8 = pneg %p1199_p7 }
 0x1ee   : > { %p1206_p13 = por %p1205_p12, %p1204_p11 }
 0x1f0   : > { %p1207_p0 = pnand %p1206_p13, %p1200_p8 }
 0x1f2   : > { %1210 = shalt.err (!%p1207_p0)
}
 0x1f3   : > { %1063 = dma.vmem_to_hbm [thread:$0]  (%p1317_p5), %s1537_s23, 128, %s1535_s30, %s872_s7  }
 0x1f4 PF: > { %p1069_p1 = scmp.ge.s32.totalorder %s1245_s21, 2  ;;  %s897_s16 = sand.u32 1, %s1233_s18  }
 0x1f5   : > { %s898_s17 = scalar_lea.sflag [#allocation3], %s897_s16 }
 0x1f6   : > { %p1066_p2 = pnand %p1069_p1, %p1321_p6 }
 0x1f8   : > { %1228 = dma.done.wait (!%p1066_p2), %s898_s17, 128  }
 0x1f9   : > { %1230 = vsyncadd (!%p1066_p2), %s898_s17, 4294967168  ;;  %p15_p3 = scmp.ge.s32.totalorder %s1304_s24, 4   ;;  %s1585_s18 = smov %s1237_s19 }
 0x1fa   : > { %s1586_s19 = smov %s1241_s20  ;;  %s1587_s20 = smov %s1315_s27 }
 0x1fb   : > { %s1588_s21 = smov %s1304_s24  ;;  %17 = sbr.rel (!%p15_p3) target bundleno = 3 (0x3), region = 75 }
 0x202   :  { %903 = vsyncpa [#allocation3], 1 }
 0x203   :  { %905 = vsyncpa [#allocation3 + $0x1], 1 }

</bundles_post_ra>
